<compile_context>
chip_gen: v6e
topology: v6e:2x2x1
jax: 0.10.0
libtpu: 0.0.40
codegen_flags: <defaults>
</compile_context>

<pallas_src>
import functools

import jax
import jax.numpy as jnp
from jax.experimental import pallas as pl
from jax.experimental.pallas import tpu as pltpu


_LANE = 128
_MAX_TILE_BYTES = 8 * 1024 * 1024      # single-buffered fill scratch cap (all gens)
_NSLOTS = 4                            # outstanding full-tile DMAs (power of two)
_VMEM_LIMIT_BYTES = 32 * 1024 * 1024   # covers scratch on v5e/v6e/v7x


def _fill_value(dtype):
    """-inf, or the most-negative finite value for dtypes with no infinity."""
    dname = jnp.dtype(dtype).name
    if dname.startswith("float8_e4m3") or dname.startswith("float8_e8m0") or "fnuz" in dname:
        return float(jnp.finfo(dtype).min)
    return float("-inf")


def _attn_dropout_kernel(mask_ref, x_hbm, o_hbm, neg_buf, pend_ref, sem, *, fill_val):
    """One grid step == one batch row.

    mask_ref : SMEM int32[B]             scalar-prefetched Bernoulli sample
    x_hbm    : HBM  (B, rows, 128)       pl.ANY; aliased onto o_hbm, never read
    o_hbm    : HBM  (B, rows, 128)       pl.ANY; aliased onto x
    neg_buf  : VMEM (tile_rows, 128)     fill scratch, written ONCE at step 0
    pend_ref : SMEM int32[_NSLOTS + 1]   per-slot "DMA outstanding" flags
    sem      : DMA sems (_NSLOTS + 1,)   slot _NSLOTS is the remainder tile
    """
    del x_hbm  # only present to establish the input/output alias
    b = pl.program_id(0)
    tile_rows = neg_buf.shape[0]
    rows = o_hbm.shape[1]
    n_full = rows // tile_rows          # Python ints at trace time
    rem = rows % tile_rows

    # ---- one-time init: fill scratch + clear pending flags (single TC,
    # dimension_semantics=("arbitrary",), so step 0 owns the scratch). ----
    @pl.when(b == 0)
    def _init():
        neg_buf[...] = jnp.full(neg_buf.shape, fill_val, neg_buf.dtype)
        for s in range(_NSLOTS + 1):
            pend_ref[s] = 0

    def full_copy(start, slot):
        return pltpu.make_async_copy(
            neg_buf, o_hbm.at[b, pl.ds(start, tile_rows), :], sem.at[slot])

    def rem_copy(row_start):
        return pltpu.make_async_copy(
            neg_buf.at[pl.ds(0, rem), :],
            o_hbm.at[b, pl.ds(row_start, rem), :],
            sem.at[_NSLOTS])

    # ---- dropped row: stream fill tiles into HBM; wait a slot only right
    # before reuse (copies may stay in flight across grid steps). ----
    @pl.when(mask_ref[b] != 0)
    def _drop_row():
        @pl.loop(0, n_full)
        def _(t):
            slot = t & (_NSLOTS - 1)

            @pl.when(pend_ref[slot] != 0)
            def _():
                full_copy(0, slot).wait()   # shape-only descriptor for the wait

            full_copy(pl.multiple_of(t * tile_rows, tile_rows), slot).start()
            pend_ref[slot] = 1

        if rem > 0:
            @pl.when(pend_ref[_NSLOTS] != 0)
            def _():
                rem_copy(0).wait()

            rem_copy(n_full * tile_rows).start()
            pend_ref[_NSLOTS] = 1

    # ---- drain every outstanding copy before the kernel exits. ----
    @pl.when(b == pl.num_programs(0) - 1)
    def _drain():
        for s in range(_NSLOTS):
            @pl.when(pend_ref[s] != 0)
            def _(s=s):
                full_copy(0, s).wait()
                pend_ref[s] = 0
        if rem > 0:
            @pl.when(pend_ref[_NSLOTS] != 0)
            def _():
                rem_copy(0).wait()
                pend_ref[_NSLOTS] = 0


def attn_dropout(x, mask, *, training=True):
    """Pallas implementation of AttnDropout.forward.

    x    : (B, ...) float array (e.g. per-head attention scores).
    mask : (B,) Bernoulli(p_dropout) sample; rows with mask != 0 are filled
           with -inf.

    NOTE: the kernel aliases the output onto `x` so kept rows cost zero HBM
    traffic — but only if `x` is donated (jax.jit(..., donate_argnums=(0,)));
    otherwise XLA inserts a defensive full-tensor copy before the kernel.
    """
    if not training:
        return x                                   # nn.Identity path

    B = x.shape[0]
    tail = 1
    for d in x.shape[1:]:
        tail *= d

    if tail % _LANE != 0:
        # TODO(synk): lane-unaligned tails fall back to a fused XLA select;
        # the Pallas fast path requires prod(x.shape[1:]) % 128 == 0.
        keep_shape = (B,) + (1,) * (x.ndim - 1)
        return jnp.where((mask != 0).reshape(keep_shape),
                         jnp.asarray(_fill_value(x.dtype), x.dtype), x)

    rows = tail // _LANE
    itemsize = jnp.dtype(x.dtype).itemsize
    sublane = max(8, 32 // itemsize)               # (8,128) f32 / (16,128) bf16
    cap_rows = max(sublane,
                   (_MAX_TILE_BYTES // (_LANE * itemsize) // sublane) * sublane)
    tile_rows = rows if rows <= cap_rows else cap_rows   # fixed tile + remainder

    x3 = x.reshape(B, rows, _LANE)                 # lane-dense layout

    kernel = functools.partial(_attn_dropout_kernel, fill_val=_fill_value(x.dtype))

    out3 = pl.pallas_call(
        kernel,
        out_shape=jax.ShapeDtypeStruct((B, rows, _LANE), x.dtype),
        grid_spec=pltpu.PrefetchScalarGridSpec(
            num_scalar_prefetch=1,                 # mask -> SMEM
            grid=(B,),
            in_specs=[pl.BlockSpec(memory_space=pl.ANY)],    # x stays in HBM
            out_specs=pl.BlockSpec(memory_space=pl.ANY),     # out stays in HBM
            scratch_shapes=[
                pltpu.VMEM((tile_rows, _LANE), x.dtype),     # fill tile (step-0 init)
                pltpu.SMEM((_NSLOTS + 1,), jnp.int32),       # per-slot pending flags
                pltpu.SemaphoreType.DMA((_NSLOTS + 1,)),     # deep write pipeline
            ],
        ),
        # Alias output onto x (flattened call-arg index 1: mask is 0, x is 1).
        input_output_aliases={1: 0},
        compiler_params=pltpu.CompilerParams(
            # One TC owns the whole grid: makes the step-0 scratch fill valid
            # for every row (incl. 2-TC v7x); dropped rows are HBM-write-bound
            # so a second core would add setup cost, not bandwidth.
            dimension_semantics=("arbitrary",),
            vmem_limit_bytes=_VMEM_LIMIT_BYTES,
        ),
    )(mask.astype(jnp.int32), x3)

    return out3.reshape(x.shape)


if __name__ == "__main__":
    p_dropout = 0.1
    B, H, S = 2, 4, 16          # small attention-score-like tensor (B, H, S, S)

    key = jax.random.PRNGKey(0)
    kx, km = jax.random.split(key)

    x = jax.random.normal(kx, (B, H, S, S), dtype=jnp.float32)
    # Bernoulli(p) sample over the batch dimension, as in AttnDropout.forward.
    mask = jax.random.bernoulli(km, p_dropout, (B,)).astype(jnp.int32)

    out = jax.block_until_ready(attn_dropout(x, mask, training=True))

    # Reference semantics check (plain JAX).
    ref = jnp.where((mask != 0)[:, None, None, None], jnp.float32(-jnp.inf), x)
    assert out.shape == x.shape and out.dtype == x.dtype
    assert bool(jnp.all((out == ref) | (jnp.isinf(out) & jnp.isinf(ref))))

    # Force both branches so the -inf DMA path is exercised deterministically.
    mask_forced = jnp.array([1, 0], dtype=jnp.int32)
    out_f = jax.block_until_ready(attn_dropout(x, mask_forced, training=True))
    assert bool(jnp.all(jnp.isneginf(out_f[0])))
    assert bool(jnp.all(out_f[1] == x[1]))

    # Intended production entry: jit + donate x so input_output_aliases really
    # removes the defensive copy (kept rows then cost zero HBM traffic).
    donated = jax.jit(attn_dropout, static_argnames=("training",),
                      donate_argnums=(0,))
    x_copy = x + 0.0                               # fresh buffer; x stays valid
    out_d = jax.block_until_ready(donated(x_copy, mask_forced, training=True))
    assert bool(jnp.all(jnp.isneginf(out_d[0])))
    assert bool(jnp.all(out_d[1] == x[1]))

    # Eval-mode path is pure identity.
    out_eval = attn_dropout(x, mask, training=False)
    assert bool(jnp.all(out_eval == x))

    print("KERNEL_OK")
</pallas_src>

<mosaic_0001>
module attributes {stable_mosaic.version = 11 : i64} {
  func.func @_attn_dropout_kernel(%arg0: i32, %arg1: memref<2xi32, #tpu.memory_space<smem>>, %arg2: memref<2x8x128xf32, #tpu.memory_space<any>>, %arg3: memref<2x8x128xf32, #tpu.memory_space<any>>, %arg4: memref<8x128xf32, #tpu.memory_space<vmem>>, %arg5: memref<5xi32, #tpu.memory_space<smem>>, %arg6: memref<5x!tpu.dma_semaphore, #tpu.memory_space<semaphore_mem>>) attributes {dimension_semantics = [#tpu.dimension_semantics<arbitrary>], iteration_bounds = array<i64: 2>, scalar_prefetch = 1 : i64, scratch_operands = 3 : i64, tpu.core_type = #tpu.core_type<tc>, window_params = [{}, {}]} {
    %c0_i32 = arith.constant 0 : i32
    %0 = arith.cmpi eq, %arg0, %c0_i32 : i32
    %1 = arith.extui %0 : i1 to i32
    %c0_i32_0 = arith.constant 0 : i32
    %2 = arith.cmpi ne, %1, %c0_i32_0 : i32
    scf.if %2 {
      %cst = arith.constant 0xFF800000 : f32
      %11 = vector.broadcast %cst : f32 to vector<8x128xf32>
      %c0 = arith.constant 0 : index
      %c0_4 = arith.constant 0 : index
      %12 = vector.load %arg4[%c0, %c0_4] : memref<8x128xf32, #tpu.memory_space<vmem>>, vector<8x128xf32>
      tpu.vector_store %arg4[%c0, %c0_4], %11 {strides = array<i32>} : memref<8x128xf32, #tpu.memory_space<vmem>>, vector<8x128xf32>,
      %c0_i32_5 = arith.constant 0 : i32
      %c0_6 = arith.constant 0 : index
      %13 = memref.load %arg5[%c0_6] : memref<5xi32, #tpu.memory_space<smem>>
      memref.store %c0_i32_5, %arg5[%c0_6] : memref<5xi32, #tpu.memory_space<smem>>
      %c0_i32_7 = arith.constant 0 : i32
      %c1 = arith.constant 1 : index
      %14 = memref.load %arg5[%c1] : memref<5xi32, #tpu.memory_space<smem>>
      memref.store %c0_i32_7, %arg5[%c1] : memref<5xi32, #tpu.memory_space<smem>>
      %c0_i32_8 = arith.constant 0 : i32
      %c2 = arith.constant 2 : index
      %15 = memref.load %arg5[%c2] : memref<5xi32, #tpu.memory_space<smem>>
      memref.store %c0_i32_8, %arg5[%c2] : memref<5xi32, #tpu.memory_space<smem>>
      %c0_i32_9 = arith.constant 0 : i32
      %c3 = arith.constant 3 : index
      %16 = memref.load %arg5[%c3] : memref<5xi32, #tpu.memory_space<smem>>
      memref.store %c0_i32_9, %arg5[%c3] : memref<5xi32, #tpu.memory_space<smem>>
      %c0_i32_10 = arith.constant 0 : i32
      %c4 = arith.constant 4 : index
      %17 = memref.load %arg5[%c4] : memref<5xi32, #tpu.memory_space<smem>>
      memref.store %c0_i32_10, %arg5[%c4] : memref<5xi32, #tpu.memory_space<smem>>
    } else {
    }
    %3 = arith.index_cast %arg0 : i32 to index
    %4 = memref.load %arg1[%3] : memref<2xi32, #tpu.memory_space<smem>>
    %c0_i32_1 = arith.constant 0 : i32
    %5 = arith.cmpi ne, %4, %c0_i32_1 : i32
    %6 = arith.extui %5 : i1 to i32
    %c0_i32_2 = arith.constant 0 : i32
    %7 = arith.cmpi ne, %6, %c0_i32_2 : i32
    scf.if %7 {
      %c0_i32_4 = arith.constant 0 : i32
      %c1_i32_5 = arith.constant 1 : i32
      %11 = arith.muli %c0_i32_4, %c1_i32_5 : i32
      %c0_i32_6 = arith.constant 0 : i32
      %12 = arith.addi %c0_i32_6, %11 : i32
      %c3_i32 = arith.constant 3 : i32
      %13 = arith.andi %12, %c3_i32 : i32
      %14 = arith.index_cast %13 : i32 to index
      %15 = memref.load %arg5[%14] : memref<5xi32, #tpu.memory_space<smem>>
      %c0_i32_7 = arith.constant 0 : i32
      %16 = arith.cmpi ne, %15, %c0_i32_7 : i32
      %17 = arith.extui %16 : i1 to i32
      %c0_i32_8 = arith.constant 0 : i32
      %18 = arith.cmpi ne, %17, %c0_i32_8 : i32
      scf.if %18 {
        %c0_i32_12 = arith.constant 0 : i32
        %c0_i32_13 = arith.constant 0 : i32
        %27 = tpu.memref_slice %arg3[%arg0, %c0_i32_12, %c0_i32_13] : memref<2x8x128xf32, #tpu.memory_space<any>> -> memref<1x8x128xf32, #tpu.memory_space<any>>
        %28 = tpu.memref_squeeze %27 : memref<1x8x128xf32, #tpu.memory_space<any>> -> memref<8x128xf32, #tpu.memory_space<any>>
        %29 = tpu.memref_slice %arg6[%13] : memref<5x!tpu.dma_semaphore, #tpu.memory_space<semaphore_mem>> -> memref<1x!tpu.dma_semaphore, #tpu.memory_space<semaphore_mem>>
        %30 = tpu.memref_squeeze %29 : memref<1x!tpu.dma_semaphore, #tpu.memory_space<semaphore_mem>> -> memref<!tpu.dma_semaphore, #tpu.memory_space<semaphore_mem>>
        tpu.wait_dma2 semaphore(%30 : memref<!tpu.dma_semaphore, #tpu.memory_space<semaphore_mem>>) src(%arg4 : memref<8x128xf32, #tpu.memory_space<vmem>>) dst(%28 : memref<8x128xf32, #tpu.memory_space<any>>)
      } else {
      }
      %c8_i32 = arith.constant 8 : i32
      %19 = arith.muli %12, %c8_i32 : i32
      %20 = tpu.assume_multiple %19, 8 : i32
      %c0_i32_9 = arith.constant 0 : i32
      %21 = tpu.memref_slice %arg3[%arg0, %20, %c0_i32_9] : memref<2x8x128xf32, #tpu.memory_space<any>> -> memref<1x8x128xf32, #tpu.memory_space<any>>
      %22 = tpu.memref_squeeze %21 : memref<1x8x128xf32, #tpu.memory_space<any>> -> memref<8x128xf32, #tpu.memory_space<any>>
      %23 = tpu.memref_slice %arg6[%13] : memref<5x!tpu.dma_semaphore, #tpu.memory_space<semaphore_mem>> -> memref<1x!tpu.dma_semaphore, #tpu.memory_space<semaphore_mem>>
      %24 = tpu.memref_squeeze %23 : memref<1x!tpu.dma_semaphore, #tpu.memory_space<semaphore_mem>> -> memref<!tpu.dma_semaphore, #tpu.memory_space<semaphore_mem>>
      tpu.enqueue_dma source(%arg4 : memref<8x128xf32, #tpu.memory_space<vmem>>) target(%22 : memref<8x128xf32, #tpu.memory_space<any>>) target_semaphore(%24 : memref<!tpu.dma_semaphore, #tpu.memory_space<semaphore_mem>>)
      %c1_i32_10 = arith.constant 1 : i32
      %25 = arith.index_cast %13 : i32 to index
      %26 = memref.load %arg5[%25] : memref<5xi32, #tpu.memory_space<smem>>
      memref.store %c1_i32_10, %arg5[%25] : memref<5xi32, #tpu.memory_space<smem>>
      %c1_i32_11 = arith.constant 1 : i32
    } else {
    }
    %c1_i32 = arith.constant 1 : i32
    %8 = arith.cmpi eq, %arg0, %c1_i32 : i32
    %9 = arith.extui %8 : i1 to i32
    %c0_i32_3 = arith.constant 0 : i32
    %10 = arith.cmpi ne, %9, %c0_i32_3 : i32
    scf.if %10 {
      %c0 = arith.constant 0 : index
      %11 = memref.load %arg5[%c0] : memref<5xi32, #tpu.memory_space<smem>>
      %c0_i32_4 = arith.constant 0 : i32
      %12 = arith.cmpi ne, %11, %c0_i32_4 : i32
      %13 = arith.extui %12 : i1 to i32
      %c0_i32_5 = arith.constant 0 : i32
      %14 = arith.cmpi ne, %13, %c0_i32_5 : i32
      scf.if %14 {
        %c0_i32_12 = arith.constant 0 : i32
        %c0_i32_13 = arith.constant 0 : i32
        %c0_i32_14 = arith.constant 0 : i32
        %27 = tpu.memref_slice %arg3[%arg0, %c0_i32_13, %c0_i32_14] : memref<2x8x128xf32, #tpu.memory_space<any>> -> memref<1x8x128xf32, #tpu.memory_space<any>>
        %28 = tpu.memref_squeeze %27 : memref<1x8x128xf32, #tpu.memory_space<any>> -> memref<8x128xf32, #tpu.memory_space<any>>
        %29 = tpu.memref_slice %arg6[%c0_i32_12] : memref<5x!tpu.dma_semaphore, #tpu.memory_space<semaphore_mem>> -> memref<1x!tpu.dma_semaphore, #tpu.memory_space<semaphore_mem>>
        %30 = tpu.memref_squeeze %29 : memref<1x!tpu.dma_semaphore, #tpu.memory_space<semaphore_mem>> -> memref<!tpu.dma_semaphore, #tpu.memory_space<semaphore_mem>>
        tpu.wait_dma2 semaphore(%30 : memref<!tpu.dma_semaphore, #tpu.memory_space<semaphore_mem>>) src(%arg4 : memref<8x128xf32, #tpu.memory_space<vmem>>) dst(%28 : memref<8x128xf32, #tpu.memory_space<any>>)
        %c0_i32_15 = arith.constant 0 : i32
        %c0_16 = arith.constant 0 : index
        %31 = memref.load %arg5[%c0_16] : memref<5xi32, #tpu.memory_space<smem>>
        memref.store %c0_i32_15, %arg5[%c0_16] : memref<5xi32, #tpu.memory_space<smem>>
      } else {
      }
      %c1 = arith.constant 1 : index
      %15 = memref.load %arg5[%c1] : memref<5xi32, #tpu.memory_space<smem>>
      %c0_i32_6 = arith.constant 0 : i32
      %16 = arith.cmpi ne, %15, %c0_i32_6 : i32
      %17 = arith.extui %16 : i1 to i32
      %c0_i32_7 = arith.constant 0 : i32
      %18 = arith.cmpi ne, %17, %c0_i32_7 : i32
      scf.if %18 {
        %c1_i32_12 = arith.constant 1 : i32
        %c0_i32_13 = arith.constant 0 : i32
        %c0_i32_14 = arith.constant 0 : i32
        %27 = tpu.memref_slice %arg3[%arg0, %c0_i32_13, %c0_i32_14] : memref<2x8x128xf32, #tpu.memory_space<any>> -> memref<1x8x128xf32, #tpu.memory_space<any>>
        %28 = tpu.memref_squeeze %27 : memref<1x8x128xf32, #tpu.memory_space<any>> -> memref<8x128xf32, #tpu.memory_space<any>>
        %29 = tpu.memref_slice %arg6[%c1_i32_12] : memref<5x!tpu.dma_semaphore, #tpu.memory_space<semaphore_mem>> -> memref<1x!tpu.dma_semaphore, #tpu.memory_space<semaphore_mem>>
        %30 = tpu.memref_squeeze %29 : memref<1x!tpu.dma_semaphore, #tpu.memory_space<semaphore_mem>> -> memref<!tpu.dma_semaphore, #tpu.memory_space<semaphore_mem>>
        tpu.wait_dma2 semaphore(%30 : memref<!tpu.dma_semaphore, #tpu.memory_space<semaphore_mem>>) src(%arg4 : memref<8x128xf32, #tpu.memory_space<vmem>>) dst(%28 : memref<8x128xf32, #tpu.memory_space<any>>)
        %c0_i32_15 = arith.constant 0 : i32
        %c1_16 = arith.constant 1 : index
        %31 = memref.load %arg5[%c1_16] : memref<5xi32, #tpu.memory_space<smem>>
        memref.store %c0_i32_15, %arg5[%c1_16] : memref<5xi32, #tpu.memory_space<smem>>
      } else {
      }
      %c2 = arith.constant 2 : index
      %19 = memref.load %arg5[%c2] : memref<5xi32, #tpu.memory_space<smem>>
      %c0_i32_8 = arith.constant 0 : i32
      %20 = arith.cmpi ne, %19, %c0_i32_8 : i32
      %21 = arith.extui %20 : i1 to i32
      %c0_i32_9 = arith.constant 0 : i32
      %22 = arith.cmpi ne, %21, %c0_i32_9 : i32
      scf.if %22 {
        %c2_i32 = arith.constant 2 : i32
        %c0_i32_12 = arith.constant 0 : i32
        %c0_i32_13 = arith.constant 0 : i32
        %27 = tpu.memref_slice %arg3[%arg0, %c0_i32_12, %c0_i32_13] : memref<2x8x128xf32, #tpu.memory_space<any>> -> memref<1x8x128xf32, #tpu.memory_space<any>>
        %28 = tpu.memref_squeeze %27 : memref<1x8x128xf32, #tpu.memory_space<any>> -> memref<8x128xf32, #tpu.memory_space<any>>
        %29 = tpu.memref_slice %arg6[%c2_i32] : memref<5x!tpu.dma_semaphore, #tpu.memory_space<semaphore_mem>> -> memref<1x!tpu.dma_semaphore, #tpu.memory_space<semaphore_mem>>
        %30 = tpu.memref_squeeze %29 : memref<1x!tpu.dma_semaphore, #tpu.memory_space<semaphore_mem>> -> memref<!tpu.dma_semaphore, #tpu.memory_space<semaphore_mem>>
        tpu.wait_dma2 semaphore(%30 : memref<!tpu.dma_semaphore, #tpu.memory_space<semaphore_mem>>) src(%arg4 : memref<8x128xf32, #tpu.memory_space<vmem>>) dst(%28 : memref<8x128xf32, #tpu.memory_space<any>>)
        %c0_i32_14 = arith.constant 0 : i32
        %c2_15 = arith.constant 2 : index
        %31 = memref.load %arg5[%c2_15] : memref<5xi32, #tpu.memory_space<smem>>
        memref.store %c0_i32_14, %arg5[%c2_15] : memref<5xi32, #tpu.memory_space<smem>>
      } else {
      }
      %c3 = arith.constant 3 : index
      %23 = memref.load %arg5[%c3] : memref<5xi32, #tpu.memory_space<smem>>
      %c0_i32_10 = arith.constant 0 : i32
      %24 = arith.cmpi ne, %23, %c0_i32_10 : i32
      %25 = arith.extui %24 : i1 to i32
      %c0_i32_11 = arith.constant 0 : i32
      %26 = arith.cmpi ne, %25, %c0_i32_11 : i32
      scf.if %26 {
        %c3_i32 = arith.constant 3 : i32
        %c0_i32_12 = arith.constant 0 : i32
        %c0_i32_13 = arith.constant 0 : i32
        %27 = tpu.memref_slice %arg3[%arg0, %c0_i32_12, %c0_i32_13] : memref<2x8x128xf32, #tpu.memory_space<any>> -> memref<1x8x128xf32, #tpu.memory_space<any>>
        %28 = tpu.memref_squeeze %27 : memref<1x8x128xf32, #tpu.memory_space<any>> -> memref<8x128xf32, #tpu.memory_space<any>>
        %29 = tpu.memref_slice %arg6[%c3_i32] : memref<5x!tpu.dma_semaphore, #tpu.memory_space<semaphore_mem>> -> memref<1x!tpu.dma_semaphore, #tpu.memory_space<semaphore_mem>>
        %30 = tpu.memref_squeeze %29 : memref<1x!tpu.dma_semaphore, #tpu.memory_space<semaphore_mem>> -> memref<!tpu.dma_semaphore, #tpu.memory_space<semaphore_mem>>
        tpu.wait_dma2 semaphore(%30 : memref<!tpu.dma_semaphore, #tpu.memory_space<semaphore_mem>>) src(%arg4 : memref<8x128xf32, #tpu.memory_space<vmem>>) dst(%28 : memref<8x128xf32, #tpu.memory_space<any>>)
        %c0_i32_14 = arith.constant 0 : i32
        %c3_15 = arith.constant 3 : index
        %31 = memref.load %arg5[%c3_15] : memref<5xi32, #tpu.memory_space<smem>>
        memref.store %c0_i32_14, %arg5[%c3_15] : memref<5xi32, #tpu.memory_space<smem>>
      } else {
      }
    } else {
    }
    return
  }
}

</mosaic_0001>

<bundles_post_ra>
// kernel: tpu_custom_call.1
= control target key start
LH: loop header
LB: loop body
LE: loop exit
PB: predicated region body
PF: predicated region fallthrough
CT: control target
= control target key end

     0   :  { %s373_s0 = inlined_call_operand.vmem [shape: s32[2], index: 0, kind: input, shape index: {}]   ;;  %s374_s1 = inlined_call_operand.hbm [shape: f32[2,8,128], index: 1, kind: input, shape index: {}, may-alias: {1,2}]   ;;  %s375_s2 = inlined_call_operand.hbm [shape: f32[2,8,128], index: 2, kind: output, shape index: {}, may-alias: {1,2}]  }
   0x1   :  { %s7_s11 = sshll.u32 %s373_s0, 4  ;;  %s8_s11 = int_to_ptr.vmem [resolvable:$true] %s7_s11 }
   0x2   :  { %s239_s12 = scalar_lea.vmem %s8_s11, 16  ;;  %p244_p1 = scmp.lt.s32.totalorder %s8_s11, %s8_s11 }
   0x3   :  { %p240_p0 = scmp.ne.s32.totalorder %s8_s11, %s239_s12  ;;  %p245_p2 = scmp.lt.s32.totalorder %s239_s12, %s239_s12 }
   0x5   :  { %p246_p3 = por %p245_p2, %p244_p1 }
   0x7   :  { %p247_p4 = pnand %p246_p3, %p240_p0 }
   0x9   :  { %250 = shalt.err (!%p247_p4)  }
   0xa   :  { %s307_s13 = smov [#allocation6]  }
   0xb   :  { %10 = dma.vmem_to_smem %s8_s11, 16, %s307_s13, [#allocation5] }
   0xc   :  { %281 = dma.done.wait [#allocation5], 16 }
   0xd   :  { %282 = vsyncadd [#allocation5], 4294967280 }
   0xe   :  { %12 = sfence }
   0xf   :  { %s331_s1 = smov 0  }
  0x10 LB: > { %p154_p5 = scmp.ne.s32.totalorder %s305_s1, 0  ;;  %s305_s1 = sphi %s331_s1, %s18_s1  }
  0x11   : > { %s309_s0 = smov (!%p154_p5), 0  }
  0x12   : > { %23 = sbr.rel (%p154_p5) target bundleno = 25 (0x19), region = 12  ;;  %26 = sst [smem:[#allocation3]] (!%p154_p5), %s309_s0 }
  0x13   : > { %28 = sst [smem:[#allocation3 + $0x1]] (!%p154_p5), %s309_s0 }
  0x14   : > { %30 = sst [smem:[#allocation3 + $0x2]] (!%p154_p5), %s309_s0 }
  0x15   : > { %32 = sst [smem:[#allocation3 + $0x3]] (!%p154_p5), %s309_s0 }
  0x16   : > { %34 = sst [smem:[#allocation3 + $0x4]] (!%p154_p5), %s309_s0 }
  0x17   : > { %v308_v0 = vmov -inf  }
  0x18   : > { %24 = vst [vmem:[#allocation2] sm:$0xff] %v308_v0 }
  0x19 PF: > { %s338_s14 = sld [smem:[#allocation6 + %s305_s1]] }
  0x1a   : > { %s40_s15 = sld [smem:[#allocation3]] }
  0x1f   : > { %p218_p6 = scmp.ne.s32.totalorder %s338_s14, 0 }
  0x20   : > { %p219_p7 = scmp.ne.s32.totalorder %s40_s15, 0 }
  0x22   : > { %p188_p8 = pnand %p219_p7, %p218_p6 }
  0x24   : > { %p189_p9 = pneg %p188_p8 }
  0x26   : > { %284 = dma.done.wait (%p189_p9), [#allocation4], 128 }
  0x27   : > { %286 = vsyncadd (%p189_p9), [#allocation4], 4294967168  ;;  %s310_s16 = smov 1   ;;  %s172_s17 = sshll.u32 %s305_s1, 7 }
  0x28   : > { %192 = sst [smem:[#allocation3]] (%p218_p6), %s310_s16  ;;  %s51_s21 = scalar_lea.hbm %s375_s2, %s172_s17 }
  0x29   : > { %s69_s18 = sld [smem:[#allocation3]]  ;;  %s311_s22 = smov [#allocation2]  }
  0x2a   : > { %s59_s23 = sshll.u32 %s311_s22, 4  ;;  %p220_p10 = scmp.eq.s32.totalorder %s305_s1, 1  ;;  %s60_s23 = int_to_ptr.vmem [resolvable:$true] %s59_s23 }
  0x2b   : > { %s251_s24 = scalar_lea.vmem %s60_s23, 128  ;;  %p258_p0 = scmp.lt.s32.totalorder %s60_s23, %s60_s23 }
  0x2c   : > { %p252_p11 = scmp.ne.s32.totalorder %s60_s23, %s251_s24  ;;  %p259_p1 = scmp.lt.s32.totalorder %s251_s24, %s251_s24 }
  0x2e   : > { %p253_p12 = pnand %p252_p11, %p218_p6  ;;  %p260_p2 = por %p259_p1, %p258_p0 }
  0x30   : > { %p254_p13 = pneg %p253_p12 }
  0x32   : > { %p261_p3 = pnand %p260_p2, %p254_p13 }
  0x34   : > { %264 = shalt.err (!%p261_p3)  }
  0x35   : > { %s265_s25 = scalar_lea.hbm %s51_s21, 128  ;;  %s269_s28 = scalar_lea.hbm %s375_s2, 256 }
  0x36   : > { %p266_p4 = scmp.ne.s32.totalorder %s51_s21, %s265_s25  ;;  %p270_p8 = scmp.lt.s32.totalorder %s51_s21, %s375_s2 }
  0x37   : > { %p271_p9 = scmp.lt.s32.totalorder %s269_s28, %s265_s25 }
  0x38   : > { %p267_p5 = pnand %p266_p4, %p218_p6 }
  0x39   : > { %p272_p11 = por %p271_p9, %p270_p8 }
  0x3a   : > { %p268_p7 = pneg %p267_p5 }
  0x3c   : > { %p273_p12 = pnand %p272_p11, %p268_p7 }
  0x3e   : > { %276 = shalt.err (!%p273_p12)  }
  0x3f   : > { %191 = dma.vmem_to_hbm [thread:$0]  (%p218_p6), %s60_s23, 128, %s51_s21, [#allocation4] }
  0x40   : > { %p221_p13 = scmp.ne.s32.totalorder %s69_s18, 0 }
  0x42   : > { %p194_p0 = pnand %p221_p13, %p220_p10 }
  0x44   : > { %p195_p1 = pneg %p194_p0 }
  0x46   : > { %288 = dma.done.wait (%p195_p1), [#allocation4], 128 }
  0x47   : > { %290 = vsyncadd (%p195_p1), [#allocation4], 4294967168  ;;  %s312_s3 = smov 0   ;;  %s161_s4 = sld [smem:[#allocation3 + $0x1]] }
  0x48   : > { %199 = sst [smem:[#allocation3]] (!%p194_p0), %s312_s3 }
  0x4d   : > { %p222_p2 = scmp.ne.s32.totalorder %s161_s4, 0 }
  0x4f   : > { %p200_p3 = pnand %p222_p2, %p220_p10 }
  0x51   : > { %p201_p4 = pneg %p200_p3 }
  0x53   : > { %292 = dma.done.wait (%p201_p4), [#allocation4 + $0x1], 128 }
  0x54   : > { %294 = vsyncadd (%p201_p4), [#allocation4 + $0x1], 4294967168  ;;  %205 = sst [smem:[#allocation3 + $0x1]] (!%p200_p3), %s312_s3 }
  0x55   : > { %s163_s5 = sld [smem:[#allocation3 + $0x2]] }
  0x5b   : > { %p223_p6 = scmp.ne.s32.totalorder %s163_s5, 0 }
  0x5d   : > { %p206_p5 = pnand %p223_p6, %p220_p10 }
  0x5f   : > { %p207_p7 = pneg %p206_p5 }
  0x61   : > { %296 = dma.done.wait (%p207_p7), [#allocation4 + $0x2], 128 }
  0x62   : > { %298 = vsyncadd (%p207_p7), [#allocation4 + $0x2], 4294967168  ;;  %211 = sst [smem:[#allocation3 + $0x2]] (!%p206_p5), %s312_s3 }
  0x63   : > { %s165_s6 = sld [smem:[#allocation3 + $0x3]] }
  0x69   : > { %p224_p8 = scmp.ne.s32.totalorder %s165_s6, 0 }
  0x6b   : > { %p212_p9 = pnand %p224_p8, %p220_p10 }
  0x6d   : > { %p213_p11 = pneg %p212_p9 }
  0x6f   : > { %300 = dma.done.wait (%p213_p11), [#allocation4 + $0x3], 128 }
  0x70   : > { %302 = vsyncadd (%p213_p11), [#allocation4 + $0x3], 4294967168  ;;  %217 = sst [smem:[#allocation3 + $0x3]] (!%p212_p9), %s312_s3  ;;  %s18_s1 = sadd.s32 1, %s305_s1  }
  0x71   : > { %p15_p12 = scmp.ge.s32.totalorder %s18_s1, 2  }
  0x73   :  { %17 = sbr.rel (!%p15_p12) target bundleno = 16 (0x10), region = 73 }
  0x78   :  { %112 = vsyncmov [#allocation4] }
  0x7b   :  { %s113_s7 = vpop.sfrf %112 }
  0x7c   :  { %p167_p13 = scmp.ne.s32.totalorder %s113_s7, 0 }
  0x7e   :  { %117 = shalt.err (%p167_p13)  }
  0x7f   :  { %119 = vsyncmov [#allocation4 + $0x1] }
  0x82   :  { %s120_s8 = vpop.sfrf %119 }
  0x83   :  { %p168_p0 = scmp.ne.s32.totalorder %s120_s8, 0 }
  0x85   :  { %124 = shalt.err (%p168_p0)  }
  0x86   :  { %126 = vsyncmov [#allocation4 + $0x2] }
  0x89   :  { %s127_s9 = vpop.sfrf %126 }
  0x8a   :  { %p169_p10 = scmp.ne.s32.totalorder %s127_s9, 0 }
  0x8c   :  { %131 = shalt.err (%p169_p10)  }
  0x8d   :  { %133 = vsyncmov [#allocation4 + $0x3] }
  0x90   :  { %s134_s10 = vpop.sfrf %133 }
  0x91   :  { %p170_p1 = scmp.ne.s32.totalorder %s134_s10, 0 }
  0x93   :  { %138 = shalt.err (%p170_p1)  }
  0x94   :  { %140 = vsyncmov [#allocation4 + $0x4] }
  0x97   :  { %s141_s11 = vpop.sfrf %140 }
  0x98   :  { %p171_p2 = scmp.ne.s32.totalorder %s141_s11, 0 }
  0x9a   :  { %145 = shalt.err (%p171_p2)  }

</bundles_post_ra>
